<compile_context>
chip_gen: v7x
topology: tpu7x:2x2x1
jax: 0.10.0
libtpu: 0.0.40
codegen_flags: <defaults>
</compile_context>

<pallas_src>
import jax
import jax.numpy as jnp
from jax.experimental import pallas as pl
from jax.experimental.pallas import tpu as pltpu

IN_DIM = 16
HID = 128
OUT_DIM = 60
OUT_PAD = 128            # lane-dense padded output width (multiple of 128)
DEFAULT_BLOCK_M = 1024   # batch tile (multiple of 16; mem-bound sweet spot)


def _round_up(n, m):
    return ((n + m - 1) // m) * m


def mlp_kernel(x_ref,
               w1_ref, b1_ref,
               w2_ref, b2_ref,
               w3_ref, b3_ref,
               w4_ref, b4_ref,
               o_ref):
    # Matmuls on the MXU with bf16 operands and f32 accumulation;
    # bias-add + ReLU on the VPU in f32 (portable across v5e/v6e/v7x).
    x = x_ref[...]  # already bf16

    h = jnp.dot(x, w1_ref[...], preferred_element_type=jnp.float32) + b1_ref[...]
    h = jnp.maximum(h, 0.0)

    h = jnp.dot(h.astype(jnp.bfloat16), w2_ref[...],
                preferred_element_type=jnp.float32) + b2_ref[...]
    h = jnp.maximum(h, 0.0)

    h = jnp.dot(h.astype(jnp.bfloat16), w3_ref[...],
                preferred_element_type=jnp.float32) + b3_ref[...]
    h = jnp.maximum(h, 0.0)

    out = jnp.dot(h.astype(jnp.bfloat16), w4_ref[...],
                  preferred_element_type=jnp.float32) + b4_ref[...]
    o_ref[...] = out.astype(o_ref.dtype)


def mlp_forward_padded(x, packed_params, *, block_m=DEFAULT_BLOCK_M):
    """x: [B, 16] float32 (or bf16).
    packed_params: 4 x (W_bf16[in, out_padded], b_f32[1, out_padded]).
    Returns the lane-dense padded logits [B, 128] (columns 60..127 are zero+bias-pad
    garbage-free: weight/bias pads are zero, so they are exactly 0)."""
    B = x.shape[0]
    (w1, b1), (w2, b2), (w3, b3), (w4, b4) = packed_params

    # Cast the input stream to bf16 once (kernel uses bf16 matmul operands anyway).
    x = x.astype(jnp.bfloat16)

    # Batch tile: as large as block_m, but clamped so the grid has >= 2 steps
    # (v7x megacore sharding).  Multiple of 16 for bf16 sublane packing.
    tm = min(block_m, _round_up(pl.cdiv(B, 2), 16))
    tm = max(tm, 16)

    grid = (pl.cdiv(B, tm),)   # ragged last block handled (masked) by Pallas

    def x_map(i):
        return (i, 0)

    def const_map(i):
        return (0, 0)

    in_specs = [
        pl.BlockSpec((tm, IN_DIM), x_map),
        pl.BlockSpec(w1.shape, const_map), pl.BlockSpec(b1.shape, const_map),
        pl.BlockSpec(w2.shape, const_map), pl.BlockSpec(b2.shape, const_map),
        pl.BlockSpec(w3.shape, const_map), pl.BlockSpec(b3.shape, const_map),
        pl.BlockSpec(w4.shape, const_map), pl.BlockSpec(b4.shape, const_map),
    ]
    out_spec = pl.BlockSpec((tm, OUT_PAD), x_map)

    # Only raise the scoped-VMEM limit if the tile is pushed very high
    # (v5e's default scoped limit is 16 MiB); TM<=1024 fits comfortably.
    vmem_limit = (64 * 1024 * 1024) if tm >= 2048 else None

    out_padded = pl.pallas_call(
        mlp_kernel,
        out_shape=jax.ShapeDtypeStruct((B, OUT_PAD), jnp.float32),
        grid=grid,
        in_specs=in_specs,
        out_specs=out_spec,
        compiler_params=pltpu.CompilerParams(
            dimension_semantics=("parallel",),
            vmem_limit_bytes=vmem_limit),
    )(x, w1, b1, w2, b2, w3, b3, w4, b4)

    return out_padded


def neural_network_forward(x, packed_params, *, block_m=DEFAULT_BLOCK_M):
    """Module-equivalent forward: logits [B, 60].
    (Prefer consuming mlp_forward_padded's [B,128] buffer directly downstream;
    this slice is an extra HBM pass.)"""
    return mlp_forward_padded(x, packed_params, block_m=block_m)[:, :OUT_DIM]


def init_params(key):
    """PyTorch-style init. Weights stored as [in, out] (transpose of nn.Linear),
    biases as [1, out], both f32."""
    dims = [(IN_DIM, HID), (HID, HID), (HID, HID), (HID, OUT_DIM)]
    params = []
    for (fin, fout) in dims:
        key, kw, kb = jax.random.split(key, 3)
        bound = 1.0 / jnp.sqrt(jnp.float32(fin))
        w = jax.random.uniform(kw, (fin, fout), jnp.float32, -bound, bound)
        b = jax.random.uniform(kb, (1, fout), jnp.float32, -bound, bound)
        params.append((w, b))
    return params


def pack_params(params):
    """bf16 weights, f32 biases; final layer zero-padded 60 -> 128 lanes."""
    packed = []
    n = len(params)
    for idx, (w, b) in enumerate(params):
        if idx == n - 1:
            pad = OUT_PAD - w.shape[1]
            w = jnp.pad(w, ((0, 0), (0, pad)))
            b = jnp.pad(b, ((0, 0), (0, pad)))
        packed.append((w.astype(jnp.bfloat16), b.astype(jnp.float32)))
    return packed


def reference_forward(x, params):
    """Plain-JAX reference with the same numerics as the kernel
    (bf16 matmul operands, f32 accumulation / bias / ReLU)."""
    h = x
    for i, (w, b) in enumerate(params):
        h = jnp.dot(h.astype(jnp.bfloat16), w.astype(jnp.bfloat16),
                    preferred_element_type=jnp.float32) + b
        if i < len(params) - 1:
            h = jnp.maximum(h, 0.0)
    return h


if __name__ == "__main__":
    key = jax.random.PRNGKey(0)
    kx, kx2, kp = jax.random.split(key, 3)

    params = init_params(kp)
    packed = pack_params(params)

    # Small-batch check (single ragged tile).
    batch = 8
    x = jax.random.normal(kx, (batch, IN_DIM), dtype=jnp.float32)
    out = jax.block_until_ready(neural_network_forward(x, packed))
    ref = reference_forward(x, params)
    assert out.shape == (batch, OUT_DIM)
    assert jnp.allclose(out, ref, atol=2e-3, rtol=2e-3)

    # Larger, non-multiple batch (exercises 2-step grid + ragged last block, no padding).
    batch2 = 300
    x2 = jax.random.normal(kx2, (batch2, IN_DIM), dtype=jnp.float32)
    out2_padded = jax.block_until_ready(mlp_forward_padded(x2, packed))
    assert out2_padded.shape == (batch2, OUT_PAD)
    out2 = out2_padded[:, :OUT_DIM]
    ref2 = reference_forward(x2, params)
    assert out2.shape == (batch2, OUT_DIM)
    assert jnp.allclose(out2, ref2, atol=2e-3, rtol=2e-3)

    print("KERNEL_OK")
</pallas_src>

<mosaic_0001>
module attributes {stable_mosaic.version = 11 : i64} {
  func.func @mlp_kernel(%arg0: i32, %arg1: memref<16x16xbf16, #tpu.memory_space<vmem>>, %arg2: memref<16x128xbf16, #tpu.memory_space<vmem>>, %arg3: memref<1x128xf32, #tpu.memory_space<vmem>>, %arg4: memref<128x128xbf16, #tpu.memory_space<vmem>>, %arg5: memref<1x128xf32, #tpu.memory_space<vmem>>, %arg6: memref<128x128xbf16, #tpu.memory_space<vmem>>, %arg7: memref<1x128xf32, #tpu.memory_space<vmem>>, %arg8: memref<128x128xbf16, #tpu.memory_space<vmem>>, %arg9: memref<1x128xf32, #tpu.memory_space<vmem>>, %arg10: memref<16x128xf32, #tpu.memory_space<vmem>>) attributes {dimension_semantics = [#tpu.dimension_semantics<parallel>], iteration_bounds = array<i64: 1>, scalar_prefetch = 0 : i64, scratch_operands = 0 : i64, tpu.core_type = #tpu.core_type<tc>, window_params = [{transform_indices = @transform_0, window_bounds = array<i64: 16, 16>}, {pipeline_mode = #tpu.pipeline_mode<synchronous>, transform_indices = @transform_1, window_bounds = array<i64: 16, 128>}, {pipeline_mode = #tpu.pipeline_mode<synchronous>, transform_indices = @transform_2, window_bounds = array<i64: 1, 128>}, {pipeline_mode = #tpu.pipeline_mode<synchronous>, transform_indices = @transform_3, window_bounds = array<i64: 128, 128>}, {pipeline_mode = #tpu.pipeline_mode<synchronous>, transform_indices = @transform_4, window_bounds = array<i64: 1, 128>}, {pipeline_mode = #tpu.pipeline_mode<synchronous>, transform_indices = @transform_5, window_bounds = array<i64: 128, 128>}, {pipeline_mode = #tpu.pipeline_mode<synchronous>, transform_indices = @transform_6, window_bounds = array<i64: 1, 128>}, {pipeline_mode = #tpu.pipeline_mode<synchronous>, transform_indices = @transform_7, window_bounds = array<i64: 128, 128>}, {pipeline_mode = #tpu.pipeline_mode<synchronous>, transform_indices = @transform_8, window_bounds = array<i64: 1, 128>}, {transform_indices = @transform_9, window_bounds = array<i64: 16, 128>}]} {
    %c0 = arith.constant 0 : index
    %c0_0 = arith.constant 0 : index
    %0 = vector.load %arg1[%c0, %c0_0] : memref<16x16xbf16, #tpu.memory_space<vmem>>, vector<16x16xbf16>
    %c0_1 = arith.constant 0 : index
    %c0_2 = arith.constant 0 : index
    %1 = vector.load %arg2[%c0_1, %c0_2] : memref<16x128xbf16, #tpu.memory_space<vmem>>, vector<16x128xbf16>
    %cst = arith.constant dense<0.000000e+00> : vector<16x128xf32>
    %2 = tpu.matmul %0, %1, %cst {dimension_numbers = #tpu.dot_dimension_numbers<[1], [0], [0], [1], [0, 0, 1, 1], [], []>} : vector<16x16xbf16>, vector<16x128xbf16>, vector<16x128xf32> -> vector<16x128xf32>
    %c0_3 = arith.constant 0 : index
    %c0_4 = arith.constant 0 : index
    %3 = vector.load %arg3[%c0_3, %c0_4] : memref<1x128xf32, #tpu.memory_space<vmem>>, vector<1x128xf32>
    %4 = vector.broadcast %3 : vector<1x128xf32> to vector<16x128xf32>
    %5 = arith.addf %2, %4 : vector<16x128xf32>
    %cst_5 = arith.constant 0.000000e+00 : f32
    %6 = vector.broadcast %cst_5 : f32 to vector<16x128xf32>
    %7 = arith.maximumf %5, %6 : vector<16x128xf32>
    %8 = arith.truncf %7 : vector<16x128xf32> to vector<16x128xbf16>
    %c0_6 = arith.constant 0 : index
    %c0_7 = arith.constant 0 : index
    %9 = vector.load %arg4[%c0_6, %c0_7] : memref<128x128xbf16, #tpu.memory_space<vmem>>, vector<128x128xbf16>
    %cst_8 = arith.constant dense<0.000000e+00> : vector<16x128xf32>
    %10 = tpu.matmul %8, %9, %cst_8 {dimension_numbers = #tpu.dot_dimension_numbers<[1], [0], [0], [1], [0, 0, 1, 1], [], []>} : vector<16x128xbf16>, vector<128x128xbf16>, vector<16x128xf32> -> vector<16x128xf32>
    %c0_9 = arith.constant 0 : index
    %c0_10 = arith.constant 0 : index
    %11 = vector.load %arg5[%c0_9, %c0_10] : memref<1x128xf32, #tpu.memory_space<vmem>>, vector<1x128xf32>
    %12 = vector.broadcast %11 : vector<1x128xf32> to vector<16x128xf32>
    %13 = arith.addf %10, %12 : vector<16x128xf32>
    %cst_11 = arith.constant 0.000000e+00 : f32
    %14 = vector.broadcast %cst_11 : f32 to vector<16x128xf32>
    %15 = arith.maximumf %13, %14 : vector<16x128xf32>
    %16 = arith.truncf %15 : vector<16x128xf32> to vector<16x128xbf16>
    %c0_12 = arith.constant 0 : index
    %c0_13 = arith.constant 0 : index
    %17 = vector.load %arg6[%c0_12, %c0_13] : memref<128x128xbf16, #tpu.memory_space<vmem>>, vector<128x128xbf16>
    %cst_14 = arith.constant dense<0.000000e+00> : vector<16x128xf32>
    %18 = tpu.matmul %16, %17, %cst_14 {dimension_numbers = #tpu.dot_dimension_numbers<[1], [0], [0], [1], [0, 0, 1, 1], [], []>} : vector<16x128xbf16>, vector<128x128xbf16>, vector<16x128xf32> -> vector<16x128xf32>
    %c0_15 = arith.constant 0 : index
    %c0_16 = arith.constant 0 : index
    %19 = vector.load %arg7[%c0_15, %c0_16] : memref<1x128xf32, #tpu.memory_space<vmem>>, vector<1x128xf32>
    %20 = vector.broadcast %19 : vector<1x128xf32> to vector<16x128xf32>
    %21 = arith.addf %18, %20 : vector<16x128xf32>
    %cst_17 = arith.constant 0.000000e+00 : f32
    %22 = vector.broadcast %cst_17 : f32 to vector<16x128xf32>
    %23 = arith.maximumf %21, %22 : vector<16x128xf32>
    %24 = arith.truncf %23 : vector<16x128xf32> to vector<16x128xbf16>
    %c0_18 = arith.constant 0 : index
    %c0_19 = arith.constant 0 : index
    %25 = vector.load %arg8[%c0_18, %c0_19] : memref<128x128xbf16, #tpu.memory_space<vmem>>, vector<128x128xbf16>
    %cst_20 = arith.constant dense<0.000000e+00> : vector<16x128xf32>
    %26 = tpu.matmul %24, %25, %cst_20 {dimension_numbers = #tpu.dot_dimension_numbers<[1], [0], [0], [1], [0, 0, 1, 1], [], []>} : vector<16x128xbf16>, vector<128x128xbf16>, vector<16x128xf32> -> vector<16x128xf32>
    %c0_21 = arith.constant 0 : index
    %c0_22 = arith.constant 0 : index
    %27 = vector.load %arg9[%c0_21, %c0_22] : memref<1x128xf32, #tpu.memory_space<vmem>>, vector<1x128xf32>
    %28 = vector.broadcast %27 : vector<1x128xf32> to vector<16x128xf32>
    %29 = arith.addf %26, %28 : vector<16x128xf32>
    %c0_23 = arith.constant 0 : index
    %c0_24 = arith.constant 0 : index
    %30 = vector.load %arg10[%c0_23, %c0_24] : memref<16x128xf32, #tpu.memory_space<vmem>>, vector<16x128xf32>
    tpu.vector_store %arg10[%c0_23, %c0_24], %29 {strides = array<i32>} : memref<16x128xf32, #tpu.memory_space<vmem>>, vector<16x128xf32>,
    return
  }
  func.func @transform_0(%arg0: i32) -> (i32, i32) {
    %c0_i32 = arith.constant 0 : i32
    %c0_i32_0 = arith.constant 0 : i32
    return %arg0, %c0_i32 : i32, i32
  }
  func.func @transform_1(%arg0: i32) -> (i32, i32) {
    %c0_i32 = arith.constant 0 : i32
    %c0_i32_0 = arith.constant 0 : i32
    %c0_i32_1 = arith.constant 0 : i32
    return %c0_i32, %c0_i32_0 : i32, i32
  }
  func.func @transform_2(%arg0: i32) -> (i32, i32) {
    %c0_i32 = arith.constant 0 : i32
    %c0_i32_0 = arith.constant 0 : i32
    %c0_i32_1 = arith.constant 0 : i32
    return %c0_i32, %c0_i32_0 : i32, i32
  }
  func.func @transform_3(%arg0: i32) -> (i32, i32) {
    %c0_i32 = arith.constant 0 : i32
    %c0_i32_0 = arith.constant 0 : i32
    %c0_i32_1 = arith.constant 0 : i32
    return %c0_i32, %c0_i32_0 : i32, i32
  }
  func.func @transform_4(%arg0: i32) -> (i32, i32) {
    %c0_i32 = arith.constant 0 : i32
    %c0_i32_0 = arith.constant 0 : i32
    %c0_i32_1 = arith.constant 0 : i32
    return %c0_i32, %c0_i32_0 : i32, i32
  }
  func.func @transform_5(%arg0: i32) -> (i32, i32) {
    %c0_i32 = arith.constant 0 : i32
    %c0_i32_0 = arith.constant 0 : i32
    %c0_i32_1 = arith.constant 0 : i32
    return %c0_i32, %c0_i32_0 : i32, i32
  }
  func.func @transform_6(%arg0: i32) -> (i32, i32) {
    %c0_i32 = arith.constant 0 : i32
    %c0_i32_0 = arith.constant 0 : i32
    %c0_i32_1 = arith.constant 0 : i32
    return %c0_i32, %c0_i32_0 : i32, i32
  }
  func.func @transform_7(%arg0: i32) -> (i32, i32) {
    %c0_i32 = arith.constant 0 : i32
    %c0_i32_0 = arith.constant 0 : i32
    %c0_i32_1 = arith.constant 0 : i32
    return %c0_i32, %c0_i32_0 : i32, i32
  }
  func.func @transform_8(%arg0: i32) -> (i32, i32) {
    %c0_i32 = arith.constant 0 : i32
    %c0_i32_0 = arith.constant 0 : i32
    %c0_i32_1 = arith.constant 0 : i32
    return %c0_i32, %c0_i32_0 : i32, i32
  }
  func.func @transform_9(%arg0: i32) -> (i32, i32) {
    %c0_i32 = arith.constant 0 : i32
    %c0_i32_0 = arith.constant 0 : i32
    return %arg0, %c0_i32 : i32, i32
  }
}

</mosaic_0001>

<bundles_post_ra>
// kernel: tpu_custom_call.1
= control target key start
LH: loop header
LB: loop body
LE: loop exit
PB: predicated region body
PF: predicated region fallthrough
CT: control target
= control target key end

     0   :  { %14 = vsyncpa [#allocation3], 0  ;;  %s1047_s0 = inlined_call_operand.hbm [shape: bf16[8,16], index: 0, kind: input, shape index: {}]   ;;  %s1048_s1 = inlined_call_operand.hbm [shape: bf16[16,128], index: 1, kind: input, shape index: {}]   ;;  %s1049_s2 = inlined_call_operand.vmem [shape: f32[1,128], index: 2, kind: input, shape index: {}]   ;;  %s1050_s3 = inlined_call_operand.hbm [shape: bf16[128,128], index: 3, kind: input, shape index: {}]   ;;  %s1051_s4 = inlined_call_operand.vmem [shape: f32[1,128], index: 4, kind: input, shape index: {}]   ;;  %s1052_s5 = inlined_call_operand.hbm [shape: bf16[128,128], index: 5, kind: input, shape index: {}]   ;;  %s1053_s6 = inlined_call_operand.vmem [shape: f32[1,128], index: 6, kind: input, shape index: {}]   ;;  %s1054_s7 = inlined_call_operand.hbm [shape: bf16[128,128], index: 7, kind: input, shape index: {}]   ;;  %s1055_s8 = inlined_call_operand.vmem [shape: f32[1,128], index: 8, kind: input, shape index: {}]   ;;  %s1056_s9 = inlined_call_operand.hbm [shape: f32[8,128], index: 9, kind: output, shape index: {}]  }
   0x1   :  { %15 = vsyncpa [#allocation6], 0 }
   0x2   :  { %16 = vsyncpa [#allocation9], 0 }
   0x3   :  { %17 = vsyncpa [#allocation4], 0 }
   0x4   :  { %22 = vsyncadd [#allocation3], 64  ;;  %s839_s30 = smov [#allocation5]   ;;  %s840_s11 = smov [#allocation8]  }
   0x5   :  { %s35_s10 = sshll.u32 %s839_s30, 4  ;;  %s63_s12 = sshll.u32 %s840_s11, 4  ;;  %s36_s10 = int_to_ptr.vmem [resolvable:$true] %s35_s10  ;;  %s901_s12 = int_to_ptr.vmem [resolvable:$true] %s63_s12 }
   0x6   :  { %s699_s15 = scalar_lea.hbm %s1048_s1, 128 }
   0x7   :  { %p700_p0 = scmp.ne.s32.totalorder %s1048_s1, %s699_s15  ;;  %p703_p1 = scmp.lt.u32.totalorder %s699_s15, %s1048_s1 }
   0x9   :  { %p705_p2 = pnand %p703_p1, %p700_p0 }
   0xb   :  { %708 = shalt.err (!%p705_p2)
}
   0xc   :  { %s709_s20 = scalar_lea.vmem %s36_s10, 128  ;;  %p714_p4 = scmp.lt.s32.totalorder %s36_s10, %s36_s10 }
   0xd   :  { %p710_p3 = scmp.ne.s32.totalorder %s36_s10, %s709_s20  ;;  %p715_p5 = scmp.lt.s32.totalorder %s709_s20, %s709_s20 }
   0xf   :  { %p716_p6 = por %p715_p5, %p714_p4 }
  0x11   :  { %p717_p7 = pnand %p716_p6, %p710_p3 }
  0x13   :  { %720 = shalt.err (!%p717_p7)
}
  0x14   :  { %s841_s21 = smov 64   ;;  %s842_s22 = smov 4  }
  0x15   :  { %41 = dma.hbm_to_vmem [thread:$0]  %s1048_s1, 128, %s36_s10, [#allocation6], %s841_s21, %s841_s21, %s842_s22  }
  0x16   :  { %s721_s27 = scalar_lea.hbm %s1052_s5, 1024 }
  0x17   :  { %p722_p8 = scmp.ne.s32.totalorder %s1052_s5, %s721_s27  ;;  %p725_p9 = scmp.lt.u32.totalorder %s721_s27, %s1052_s5 }
  0x19   :  { %p727_p10 = pnand %p725_p9, %p722_p8 }
  0x1b   :  { %730 = shalt.err (!%p727_p10)
}
  0x1c   :  { %s731_s13 = scalar_lea.vmem %s901_s12, 1024  ;;  %p736_p12 = scmp.lt.s32.totalorder %s901_s12, %s901_s12 }
  0x1d   :  { %p732_p11 = scmp.ne.s32.totalorder %s901_s12, %s731_s13  ;;  %p737_p13 = scmp.lt.s32.totalorder %s731_s13, %s731_s13 }
  0x1f   :  { %p738_p0 = por %p737_p13, %p736_p12 }
  0x21   :  { %p739_p1 = pnand %p738_p0, %p732_p11 }
  0x23   :  { %742 = shalt.err (!%p739_p1)
}
  0x24   :  { %69 = dma.hbm_to_vmem [thread:$0]  %s1052_s5, 1024, %s901_s12, [#allocation9], %s841_s21, %s841_s21, %s842_s22  }
  0x25   :  { %s843_s14 = smov [#allocation2]   ;;  %s844_s16 = smov [#allocation7]  }
  0x26   :  { %s23_s15 = sshll.u32 %s843_s14, 4  ;;  %s49_s17 = sshll.u32 %s844_s16, 4  ;;  %s24_s15 = int_to_ptr.vmem [resolvable:$true] %s23_s15  ;;  %s938_s17 = int_to_ptr.vmem [resolvable:$true] %s49_s17 }
  0x27   :  { %s743_s20 = scalar_lea.hbm %s1047_s0, 64 }
  0x28   :  { %p744_p2 = scmp.ne.s32.totalorder %s1047_s0, %s743_s20  ;;  %p747_p3 = scmp.lt.u32.totalorder %s743_s20, %s1047_s0 }
  0x2a   :  { %p749_p4 = pnand %p747_p3, %p744_p2 }
  0x2c   :  { %752 = shalt.err (!%p749_p4)
}
  0x2d   :  { %s753_s5 = scalar_lea.vmem %s24_s15, 64  ;;  %s757_s12 = scalar_lea.vmem %s24_s15, 128 }
  0x2e   :  { %p754_p5 = scmp.ne.s32.totalorder %s24_s15, %s753_s5  ;;  %p758_p6 = scmp.lt.s32.totalorder %s24_s15, %s24_s15 }
  0x2f   :  { %p759_p7 = scmp.lt.s32.totalorder %s757_s12, %s753_s5 }
  0x31   :  { %p760_p8 = por %p759_p7, %p758_p6 }
  0x33   :  { %p761_p9 = pnand %p760_p8, %p754_p5 }
  0x35   :  { %764 = shalt.err (!%p761_p9)
}
  0x36   :  { %29 = dma.hbm_to_vmem [thread:$0]  %s1047_s0, 64, %s24_s15, [#allocation3], %s841_s21, %s841_s21, %s842_s22  }
  0x37   :  { %s765_s11 = scalar_lea.hbm %s1050_s3, 1024 }
  0x38   :  { %p766_p10 = scmp.ne.s32.totalorder %s1050_s3, %s765_s11  ;;  %p769_p11 = scmp.lt.u32.totalorder %s765_s11, %s1050_s3 }
  0x3a   :  { %p771_p12 = pnand %p769_p11, %p766_p10 }
  0x3c   :  { %774 = shalt.err (!%p771_p12)
}
  0x3d   :  { %s775_s16 = scalar_lea.vmem %s938_s17, 1024  ;;  %p780_p0 = scmp.lt.s32.totalorder %s938_s17, %s938_s17 }
  0x3e   :  { %p776_p13 = scmp.ne.s32.totalorder %s938_s17, %s775_s16  ;;  %p781_p1 = scmp.lt.s32.totalorder %s775_s16, %s775_s16 }
  0x40   :  { %p782_p2 = por %p781_p1, %p780_p0 }
  0x42   :  { %p783_p3 = pnand %p782_p2, %p776_p13 }
  0x44   :  { %786 = shalt.err (!%p783_p3)
}
  0x45   :  { %55 = dma.hbm_to_vmem [thread:$0]  %s1050_s3, 1024, %s938_s17, [#allocation6], %s841_s21, %s841_s21, %s842_s22  }
  0x46   :  { %s845_s18 = smov [#allocation10]   ;;  %s787_s24 = scalar_lea.hbm %s1054_s7, 1024 }
  0x47   :  { %s77_s19 = sshll.u32 %s845_s18, 4  ;;  %p788_p4 = scmp.ne.s32.totalorder %s1054_s7, %s787_s24  ;;  %s78_s19 = int_to_ptr.vmem [resolvable:$true] %s77_s19 }
  0x48   :  { %p791_p5 = scmp.lt.u32.totalorder %s787_s24, %s1054_s7 }
  0x4a   :  { %p793_p6 = pnand %p791_p5, %p788_p4 }
  0x4c   :  { %796 = shalt.err (!%p793_p6)
}
  0x4d   :  { %s797_s27 = scalar_lea.vmem %s78_s19, 1024  ;;  %p802_p8 = scmp.lt.s32.totalorder %s78_s19, %s78_s19 }
  0x4e   :  { %p798_p7 = scmp.ne.s32.totalorder %s78_s19, %s797_s27  ;;  %p803_p9 = scmp.lt.s32.totalorder %s797_s27, %s797_s27 }
  0x50   :  { %p804_p10 = por %p803_p9, %p802_p8 }
  0x52   :  { %p805_p11 = pnand %p804_p10, %p798_p7 }
  0x54   :  { %808 = shalt.err (!%p805_p11)
}
  0x55   :  { %83 = dma.hbm_to_vmem [thread:$0]  %s1054_s7, 1024, %s78_s19, [#allocation9], %s841_s21, %s841_s21, %s842_s22  }
  0x56   :  { %831 = dma.done.wait [#allocation3], 128  }
  0x57   :  { %832 = vsyncadd [#allocation3], 4294967168 }
  0x58   :  { %833 = dma.done.wait [#allocation6], 1152  }
  0x59   :  { %834 = vsyncadd [#allocation6], 4294966144 }
  0x5a   :  { %835 = dma.done.wait [#allocation9], 2048  }
  0x5b   :  { %836 = vsyncadd [#allocation9], 4294965248  ;;  %v846_v0 = vmov 0.0   ;;  %vm847_vm0 = vmmov 0   ;;  %v673_v1 = vld [vmem:[#allocation5] sm:$0xff]   ;;  %v674_v2 = vld [vmem:[#allocation2] sm:$0xff]  }
  0x5c   :  { %595 = vmatprep.subr.bf16.mxu0 %v846_v0  ;;  %597 = vmatprep.mubr.msk.bf16.mxu0 %vm847_vm0, %v846_v0  ;;  %vm124_vm1 = vcmask 130048   ;;  %v675_v3 = vld [vmem:[#allocation7] sm:$0xff]   ;;  %v676_v4 = vld [vmem:[#allocation7 + $0x8] sm:$0xff]   ;;  %v677_v5 = vld [vmem:[#allocation7 + $0x10] sm:$0xff]  }
  0x5d   :  { %601 = vmatprep.subr.bf16.mxu1 %v846_v0  ;;  %617 = vmatprep.mubr.msk.bf16.mxu1 %vm847_vm0, %v846_v0  ;;  %v678_v6 = vld [vmem:[#allocation7 + $0x18] sm:$0xff]   ;;  %v679_v7 = vld [vmem:[#allocation7 + $0x20] sm:$0xff]   ;;  %v680_v8 = vld [vmem:[#allocation7 + $0x28] sm:$0xff]  }
  0x5e   :  { %596 = vmatpush3.bf16.msra.mxu0 %v673_v1  ;;  %602 = vmatpush3.bf16.msra.mxu1 %v675_v3  ;;  %v681_v9 = vld [vmem:[#allocation7 + $0x30] sm:$0xff]   ;;  %v682_v10 = vld [vmem:[#allocation7 + $0x38] sm:$0xff]   ;;  %v683_v11 = vld [vmem:[#allocation8] sm:$0xff]  }
  0x5f   :  { %621 = vmatprep.subr.bf16.mxu0 %v846_v0  ;;  %603 = vmatprep.subr.bf16.mxu1 %v846_v0  ;;  %v684_v12 = vld [vmem:[#allocation8 + $0x8] sm:$0xff]   ;;  %v685_v13 = vld [vmem:[#allocation8 + $0x10] sm:$0xff]   ;;  %v686_v14 = vld [vmem:[#allocation8 + $0x18] sm:$0xff]  }
  0x60   :  { %v687_v15 = vld [vmem:[#allocation8 + $0x20] sm:$0xff]   ;;  %v688_v16 = vld [vmem:[#allocation8 + $0x28] sm:$0xff]   ;;  %v535_v17 = vld [vmem:[%s1049_s2] ss:$0 sm:$0xff] }
  0x61   :  { %598 = vmatmul.mubr.msk.bf16.vlgmr.msra.gmra.mrb[0].mxu0 %vm124_vm1, %v674_v2  ;;  %v689_v27 = vld [vmem:[#allocation8 + $0x30] sm:$0xff]   ;;  %v690_v28 = vld [vmem:[#allocation8 + $0x38] sm:$0xff]   ;;  %v691_v29 = vld [vmem:[#allocation10] sm:$0xff]  }
  0x62   :  { %637 = vmatprep.mubr.msk.bf16.mxu0 %vm847_vm0, %v846_v0  ;;  %604 = vmatpush3.bf16.msra.mxu1 %v676_v4  ;;  %v692_v30 = vld [vmem:[#allocation10 + $0x8] sm:$0xff]   ;;  %v693_v31 = vld [vmem:[#allocation10 + $0x10] sm:$0xff]   ;;  %v694_v32 = vld [vmem:[#allocation10 + $0x18] sm:$0xff]  }
  0x63   :  { %605 = vmatprep.subr.bf16.mxu1 %v846_v0  ;;  %622 = vmatpush3.bf16.msra.mxu0 %v683_v11  ;;  %v695_v33 = vld [vmem:[#allocation10 + $0x20] sm:$0xff]   ;;  %v696_v34 = vld [vmem:[#allocation10 + $0x28] sm:$0xff]   ;;  %v539_v35 = vld [vmem:[%s1051_s4] ss:$0 sm:$0xff] }
  0x64   :  { %623 = vmatprep.subr.bf16.mxu0 %v846_v0  ;;  %v697_v45 = vld [vmem:[#allocation10 + $0x30] sm:$0xff]   ;;  %v698_v46 = vld [vmem:[#allocation10 + $0x38] sm:$0xff]  }
  0x65   :  { %v548_v47 = vld [vmem:[%s1053_s6] ss:$0 sm:$0xff] }
  0x66   :  { %606 = vmatpush3.bf16.msra.mxu1 %v677_v5  ;;  %v557_v57 = vld [vmem:[%s1055_s8] ss:$0 sm:$0xff] }
  0x67   :  { %607 = vmatprep.subr.bf16.mxu1 %v846_v0  ;;  %624 = vmatpush3.bf16.msra.mxu0 %v684_v12 }
  0x68   :  { %625 = vmatprep.subr.bf16.mxu0 %v846_v0 }
  0x6a   :  { %608 = vmatpush3.bf16.msra.mxu1 %v678_v6 }
  0x6b   :  { %609 = vmatprep.subr.bf16.mxu1 %v846_v0  ;;  %626 = vmatpush3.bf16.msra.mxu0 %v685_v13 }
  0x6c   :  { %627 = vmatprep.subr.bf16.mxu0 %v846_v0 }
  0x6e   :  { %610 = vmatpush3.bf16.msra.mxu1 %v679_v7 }
  0x6f   :  { %611 = vmatprep.subr.bf16.mxu1 %v846_v0  ;;  %628 = vmatpush3.bf16.msra.mxu0 %v686_v14 }
  0x70   :  { %629 = vmatprep.subr.bf16.mxu0 %v846_v0 }
  0x72   :  { %612 = vmatpush3.bf16.msra.mxu1 %v680_v8 }
  0x73   :  { %613 = vmatprep.subr.bf16.mxu1 %v846_v0  ;;  %630 = vmatpush3.bf16.msra.mxu0 %v687_v15 }
  0x74   :  { %631 = vmatprep.subr.bf16.mxu0 %v846_v0 }
  0x76   :  { %614 = vmatpush3.bf16.msra.mxu1 %v681_v9 }
  0x77   :  { %615 = vmatprep.subr.bf16.mxu1 %v846_v0  ;;  %632 = vmatpush3.bf16.msra.mxu0 %v688_v16 }
  0x78   :  { %633 = vmatprep.subr.bf16.mxu0 %v846_v0 }
  0x7a   :  { %616 = vmatpush3.bf16.msra.mxu1 %v682_v10 }
  0x7b   :  { %641 = vmatprep.subr.bf16.mxu1 %v846_v0  ;;  %634 = vmatpush3.bf16.msra.mxu0 %v689_v27 }
  0x7c   :  { %635 = vmatprep.subr.bf16.mxu0 %v846_v0 }
  0x7f   :  { %636 = vmatpush3.bf16.msra.mxu0 %v690_v28 }
 0x134   :  { %v162_v18 = vpop.f32.mrb[0].mxu0 }
 0x135   :  { %v163_v19 = vadd.f32 %v535_v17, %v162_v18  ;;  %v599_v20 = vpop.f32.mrb[1].mxu0 }
 0x136   :  { %v165_v21 = vpop.f32.mrb[2].mxu0 }
 0x137   :  { %v166_v22 = vadd.f32 %v535_v17, %v165_v21  ;;  %v600_v23 = vpop.f32.mrb[3].mxu0  ;;  %v169_v24 = vmax.f32 %v163_v19, 0.0 }
 0x139   :  { %v170_v25 = vmax.f32 %v166_v22, 0.0 }
 0x13b   :  { %v171_v26 = vpack.c.bf16 %v170_v25, %v169_v24 }
 0x13d   :  { %618 = vmatmul.mubr.bf16.vlgmr.msra.gmra.mrb[0].mxu1 %v171_v26 }
 0x13e   :  { %657 = vmatprep.mubr.msk.bf16.mxu1 %vm847_vm0, %v846_v0  ;;  %642 = vmatpush3.bf16.msra.mxu1 %v691_v29 }
 0x13f   :  { %643 = vmatprep.subr.bf16.mxu1 %v846_v0 }
 0x142   :  { %644 = vmatpush3.bf16.msra.mxu1 %v692_v30 }
 0x143   :  { %645 = vmatprep.subr.bf16.mxu1 %v846_v0 }
 0x146   :  { %646 = vmatpush3.bf16.msra.mxu1 %v693_v31 }
 0x147   :  { %647 = vmatprep.subr.bf16.mxu1 %v846_v0 }
 0x14a   :  { %648 = vmatpush3.bf16.msra.mxu1 %v694_v32 }
 0x14b   :  { %649 = vmatprep.subr.bf16.mxu1 %v846_v0 }
 0x14e   :  { %650 = vmatpush3.bf16.msra.mxu1 %v695_v33 }
 0x14f   :  { %651 = vmatprep.subr.bf16.mxu1 %v846_v0 }
 0x152   :  { %652 = vmatpush3.bf16.msra.mxu1 %v696_v34 }
 0x153   :  { %653 = vmatprep.subr.bf16.mxu1 %v846_v0 }
 0x156   :  { %654 = vmatpush3.bf16.msra.mxu1 %v697_v45 }
 0x157   :  { %655 = vmatprep.subr.bf16.mxu1 %v846_v0 }
 0x15a   :  { %656 = vmatpush3.bf16.msra.mxu1 %v698_v46 }
 0x210   :  { %v277_v36 = vpop.f32.mrb[0].mxu1 }
 0x211   :  { %v278_v37 = vadd.f32 %v539_v35, %v277_v36  ;;  %v619_v38 = vpop.f32.mrb[1].mxu1 }
 0x212   :  { %v280_v39 = vpop.f32.mrb[2].mxu1 }
 0x213   :  { %v281_v40 = vadd.f32 %v539_v35, %v280_v39  ;;  %v620_v41 = vpop.f32.mrb[3].mxu1  ;;  %v284_v42 = vmax.f32 %v278_v37, 0.0 }
 0x215   :  { %v285_v43 = vmax.f32 %v281_v40, 0.0 }
 0x217   :  { %v286_v44 = vpack.c.bf16 %v285_v43, %v284_v42 }
 0x219   :  { %638 = vmatmul.mubr.bf16.vlgmr.msra.gmra.mrb[4].mxu0 %v286_v44 }
 0x2ec   :  { %v392_v48 = vpop.f32.mrb[4].mxu0 }
 0x2ed   :  { %v393_v49 = vadd.f32 %v548_v47, %v392_v48  ;;  %v639_v50 = vpop.f32.mrb[5].mxu0 }
 0x2ee   :  { %v395_v51 = vpop.f32.mrb[6].mxu0 }
 0x2ef   :  { %v396_v52 = vadd.f32 %v548_v47, %v395_v51  ;;  %v640_v53 = vpop.f32.mrb[7].mxu0  ;;  %v399_v54 = vmax.f32 %v393_v49, 0.0 }
 0x2f1   :  { %v400_v55 = vmax.f32 %v396_v52, 0.0 }
 0x2f3   :  { %v401_v56 = vpack.c.bf16 %v400_v55, %v399_v54 }
 0x2f5   :  { %658 = vmatmul.mubr.bf16.vlgmr.msra.gmra.mrb[4].mxu1 %v401_v56 }
 0x3c8   :  { %v507_v58 = vpop.f32.mrb[4].mxu1 }
 0x3c9   :  { %v508_v59 = vadd.f32 %v557_v57, %v507_v58  ;;  %v659_v60 = vpop.f32.mrb[5].mxu1 }
 0x3ca   :  { %v510_v61 = vpop.f32.mrb[6].mxu1 }
 0x3cb   :  { %514 = vst [vmem:[#allocation11] sm:$0xff] %v508_v59  ;;  %v511_v62 = vadd.f32 %v557_v57, %v510_v61  ;;  %v660_v63 = vpop.f32.mrb[7].mxu1 }
 0x3cd   :  { %515 = vst [vmem:[#allocation11 + $0x8] sm:$0xff] %v511_v62 }
 0x3ce   :  { %520 = vsyncadd [#allocation4], 128  ;;  %s848_s6 = smov [#allocation11]  }
 0x3cf   :  { %s521_s11 = sshll.u32 %s848_s6, 4  ;;  %s522_s11 = int_to_ptr.vmem [resolvable:$true] %s521_s11 }
 0x3d0   :  { %s809_s13 = scalar_lea.vmem %s522_s11, 128  ;;  %s813_s1 = scalar_lea.vmem %s522_s11, 256 }
 0x3d1   :  { %p810_p12 = scmp.ne.s32.totalorder %s522_s11, %s809_s13  ;;  %p814_p13 = scmp.lt.s32.totalorder %s522_s11, %s522_s11 }
 0x3d2   :  { %p815_p0 = scmp.lt.s32.totalorder %s813_s1, %s809_s13 }
 0x3d4   :  { %p816_p1 = por %p815_p0, %p814_p13 }
 0x3d6   :  { %p817_p2 = pnand %p816_p1, %p810_p12 }
 0x3d8   :  { %820 = shalt.err (!%p817_p2)
}
 0x3d9   :  { %s821_s14 = scalar_lea.hbm %s1056_s9, 128 }
 0x3da   :  { %p822_p3 = scmp.ne.s32.totalorder %s1056_s9, %s821_s14  ;;  %p825_p4 = scmp.lt.u32.totalorder %s821_s14, %s1056_s9 }
 0x3dc   :  { %p827_p5 = pnand %p825_p4, %p822_p3 }
 0x3de   :  { %830 = shalt.err (!%p827_p5)
}
 0x3df   :  { %s849_s19 = smov 128   ;;  %s850_s20 = smov 8  }
 0x3e0   :  { %527 = dma.vmem_to_hbm [thread:$0]  %s522_s11, 128, %s1056_s9, [#allocation4], %s849_s19, %s849_s19, %s850_s20  }
 0x3e1   :  { %837 = dma.done.wait [#allocation4], 256  }
 0x3e2   :  { %838 = vsyncadd [#allocation4], 4294967040 }
 0x3e3   :  { %531 = vsyncpa [#allocation3], 1 }
 0x3e4   :  { %532 = vsyncpa [#allocation6], 1 }
 0x3e5   :  { %533 = vsyncpa [#allocation9], 1 }
 0x3e6   :  { %534 = vsyncpa [#allocation4], 1 }

</bundles_post_ra>
